<compile_context>
chip_gen: v7x
topology: tpu7x:2x2x1
jax: 0.10.0
libtpu: 0.0.40
codegen_flags: <defaults>
</compile_context>

<pallas_src>
import functools
import math

import jax
import jax.numpy as jnp
from jax import lax
from jax.experimental import pallas as pl
from jax.experimental.pallas import tpu as pltpu

_LOG2E = 1.4426950408889634


def _crate_attention_kernel(x_ref, wqkv_ref, wout_ref, o_ref,
                            w_all_ref, av_all_ref, *, scale, heads, dim_head):
    # x_ref:      (1, N, DIM)      current batch element
    # wqkv_ref:   (DIM, INNER)     resident qkv weight (pre-transposed)
    # wout_ref:   (INNER, DIM)     resident output-projection weight (pre-transposed)
    # o_ref:      (1, N, DIM)      output block
    # w_all_ref:  (N, INNER)       VMEM scratch: shared q/k/v projection
    # av_all_ref: (N, INNER)       VMEM scratch: per-head attn @ w results
    x = x_ref[0]                                                   # (N, DIM)

    # Wide, lane-dense QKV projection once per batch element (f32 accumulate).
    w_all = jnp.dot(x, wqkv_ref[...], preferred_element_type=jnp.float32)
    w_all_ref[...] = w_all.astype(w_all_ref.dtype)

    # Static unroll over heads: all scratch slices are compile-time views.
    for h in range(heads):
        lo = h * dim_head
        hi = lo + dim_head
        w_h = w_all_ref[:, lo:hi]                                  # (N, d) compute dtype

        # Fold softmax scale * log2(e) into the small (N, d) query operand.
        q_op = (w_h.astype(jnp.float32) * (scale * _LOG2E)).astype(w_h.dtype)

        # dots = q_op @ w_h^T without materializing a transpose.
        dots = lax.dot_general(
            q_op, w_h,
            dimension_numbers=(((1,), (1,)), ((), ())),
            preferred_element_type=jnp.float32)                    # (N, N) f32

        # Numerically-stable softmax numerator (f32); normalization deferred.
        m = jnp.max(dots, axis=-1, keepdims=True)
        e = jnp.exp2(dots - m)                                     # == exp(orig dots - max)
        l = jnp.sum(e, axis=-1, keepdims=True)

        # Unnormalized AV matmul, then scale the small (N, d) result by 1/l.
        av_un = jnp.dot(e.astype(w_h.dtype), w_h,
                        preferred_element_type=jnp.float32)        # (N, d) f32
        av = av_un * pl.reciprocal(l, approx=True)
        av_all_ref[:, lo:hi] = av.astype(av_all_ref.dtype)

    # One wide output projection: (N, INNER) @ (INNER, DIM), f32 accumulate.
    o_ref[0] = jnp.dot(av_all_ref[...], wout_ref[...],
                       preferred_element_type=jnp.float32).astype(o_ref.dtype)


def crate_attention(x, wqkv, wout, *, heads, dim_head, compute_dtype=None):
    """x: (B, N, DIM); wqkv: (INNER, DIM); wout: (DIM, INNER)  (PyTorch Linear layout).

    compute_dtype: dtype of the MXU operands (default: x.dtype).  Pass
    jnp.bfloat16 for production models — accumulation stays f32 either way.
    """
    B, N, DIM = x.shape
    INNER = heads * dim_head
    assert wqkv.shape == (INNER, DIM)
    assert wout.shape == (DIM, INNER)
    if compute_dtype is None:
        compute_dtype = x.dtype
    out_dtype = x.dtype
    scale = dim_head ** (-0.5)

    # Pre-transpose weights once in plain JAX so the kernel matmuls are
    # straight (M,K)x(K,N): wqkv_t (DIM, INNER), wout_t (INNER, DIM).
    xc = x.astype(compute_dtype)
    wqkv_t = wqkv.T.astype(compute_dtype)
    wout_t = wout.T.astype(compute_dtype)

    kernel = functools.partial(_crate_attention_kernel,
                               scale=scale, heads=heads, dim_head=dim_head)

    # Rough VMEM budget; raise the scoped limit only when the default (~32 MiB)
    # would be exceeded (large N), capped below physical capacity.
    cb = jnp.dtype(compute_dtype).itemsize
    ob = jnp.dtype(out_dtype).itemsize
    vmem_est = (2 * N * DIM * cb          # x double buffer
                + 2 * N * DIM * ob        # out double buffer
                + 2 * INNER * DIM * cb    # resident weights
                + 2 * N * INNER * cb      # w_all + av_all scratch
                + 3 * N * N * 4)          # per-head (N,N) f32 temporaries + headroom
    vmem_limit = None
    if vmem_est > 30 * 1024 * 1024:
        vmem_limit = min(int(vmem_est * 1.2), 120 * 1024 * 1024)

    return pl.pallas_call(
        kernel,
        out_shape=jax.ShapeDtypeStruct((B, N, DIM), out_dtype),
        grid_spec=pltpu.PrefetchScalarGridSpec(
            num_scalar_prefetch=0,
            grid=(B,),
            in_specs=[
                pl.BlockSpec((1, N, DIM), lambda b: (b, 0, 0)),
                # Weights: whole-array blocks with constant index_map -> DMA'd
                # once and kept resident across all batch elements.
                pl.BlockSpec((DIM, INNER), lambda b: (0, 0)),
                pl.BlockSpec((INNER, DIM), lambda b: (0, 0)),
            ],
            out_specs=pl.BlockSpec((1, N, DIM), lambda b: (b, 0, 0)),
            scratch_shapes=[
                pltpu.VMEM((N, INNER), compute_dtype),   # shared q/k/v projection
                pltpu.VMEM((N, INNER), compute_dtype),   # per-head AV results
            ],
        ),
        compiler_params=pltpu.CompilerParams(
            dimension_semantics=("parallel",),
            vmem_limit_bytes=vmem_limit),
    )(xc, wqkv_t, wout_t)


def _reference(x, wqkv, wout, *, heads, dim_head):
    B, N, DIM = x.shape
    scale = dim_head ** (-0.5)
    w = x @ wqkv.T                                                  # (B, N, INNER)
    w = w.reshape(B, N, heads, dim_head).transpose(0, 2, 1, 3)      # (B, H, N, d)
    dots = jnp.einsum('bhnd,bhmd->bhnm', w, w) * scale
    attn = jax.nn.softmax(dots, axis=-1)
    out = jnp.einsum('bhnm,bhmd->bhnd', attn, w)
    out = out.transpose(0, 2, 1, 3).reshape(B, N, heads * dim_head)
    return out @ wout.T


if __name__ == "__main__":
    # Small shapes consistent with the module.
    B, N, DIM = 2, 8, 32
    HEADS, DIM_HEAD = 4, 8
    INNER = HEADS * DIM_HEAD

    key = jax.random.PRNGKey(0)
    kx, kq, ko = jax.random.split(key, 3)

    x = jax.random.normal(kx, (B, N, DIM), dtype=jnp.float32)
    # Deterministic parameter init (nn.Linear-style uniform bound, no bias).
    bq = 1.0 / math.sqrt(DIM)
    bo = 1.0 / math.sqrt(INNER)
    wqkv = jax.random.uniform(kq, (INNER, DIM), minval=-bq, maxval=bq, dtype=jnp.float32)
    wout = jax.random.uniform(ko, (DIM, INNER), minval=-bo, maxval=bo, dtype=jnp.float32)

    y_ref = _reference(x, wqkv, wout, heads=HEADS, dim_head=DIM_HEAD)

    # f32-operand path (matches the harness dtype).
    y = jax.block_until_ready(
        crate_attention(x, wqkv, wout, heads=HEADS, dim_head=DIM_HEAD))
    # approx reciprocal in the softmax normalization -> ~1e-4 relative error
    assert jnp.allclose(y, y_ref, atol=5e-3, rtol=5e-3), "f32 mismatch vs reference"

    # bf16 MXU-operand path (production configuration); f32 accumulation keeps
    # it close to the f32 reference at these scales.
    y_bf16 = jax.block_until_ready(
        crate_attention(x, wqkv, wout, heads=HEADS, dim_head=DIM_HEAD,
                        compute_dtype=jnp.bfloat16))
    assert jnp.allclose(y_bf16.astype(jnp.float32), y_ref,
                        atol=5e-2, rtol=5e-2), "bf16 mismatch vs reference"

    print("KERNEL_OK")
</pallas_src>

<mosaic_0001>
module attributes {stable_mosaic.version = 11 : i64} {
  func.func @_crate_attention_kernel(%arg0: i32, %arg1: memref<1x8x32xf32, #tpu.memory_space<vmem>>, %arg2: memref<32x32xf32, #tpu.memory_space<vmem>>, %arg3: memref<32x32xf32, #tpu.memory_space<vmem>>, %arg4: memref<1x8x32xf32, #tpu.memory_space<vmem>>, %arg5: memref<8x32xf32, #tpu.memory_space<vmem>>, %arg6: memref<8x32xf32, #tpu.memory_space<vmem>>) attributes {dimension_semantics = [#tpu.dimension_semantics<parallel>], iteration_bounds = array<i64: 2>, scalar_prefetch = 0 : i64, scratch_operands = 2 : i64, tpu.core_type = #tpu.core_type<tc>, window_params = [{transform_indices = @transform_0, window_bounds = array<i64: 1, 8, 32>}, {pipeline_mode = #tpu.pipeline_mode<synchronous>, transform_indices = @transform_1, window_bounds = array<i64: 32, 32>}, {pipeline_mode = #tpu.pipeline_mode<synchronous>, transform_indices = @transform_2, window_bounds = array<i64: 32, 32>}, {transform_indices = @transform_3, window_bounds = array<i64: 1, 8, 32>}]} {
    %c0 = arith.constant 0 : index
    %c0_0 = arith.constant 0 : index
    %c0_1 = arith.constant 0 : index
    %0 = vector.load %arg1[%c0, %c0_0, %c0_1] : memref<1x8x32xf32, #tpu.memory_space<vmem>>, vector<1x8x32xf32>
    %1 = vector.shape_cast %0 : vector<1x8x32xf32> to vector<8x32xf32>
    %c0_2 = arith.constant 0 : index
    %c0_3 = arith.constant 0 : index
    %2 = vector.load %arg2[%c0_2, %c0_3] : memref<32x32xf32, #tpu.memory_space<vmem>>, vector<32x32xf32>
    %cst = arith.constant dense<0.000000e+00> : vector<8x32xf32>
    %3 = tpu.matmul %1, %2, %cst {dimension_numbers = #tpu.dot_dimension_numbers<[1], [0], [0], [1], [0, 0, 1, 1], [], []>} : vector<8x32xf32>, vector<32x32xf32>, vector<8x32xf32> -> vector<8x32xf32>
    %c0_4 = arith.constant 0 : index
    %c0_5 = arith.constant 0 : index
    %4 = vector.load %arg5[%c0_4, %c0_5] : memref<8x32xf32, #tpu.memory_space<vmem>>, vector<8x32xf32>
    tpu.vector_store %arg5[%c0_4, %c0_5], %3 {strides = array<i32>} : memref<8x32xf32, #tpu.memory_space<vmem>>, vector<8x32xf32>,
    %c0_6 = arith.constant 0 : index
    %c0_7 = arith.constant 0 : index
    %5 = vector.load %arg5[%c0_6, %c0_7] : memref<8x32xf32, #tpu.memory_space<vmem>>, vector<8x8xf32>
    %cst_8 = arith.constant 0.510069728 : f32
    %6 = vector.broadcast %cst_8 : f32 to vector<8x8xf32>
    %7 = arith.mulf %5, %6 : vector<8x8xf32>
    %cst_9 = arith.constant dense<0.000000e+00> : vector<8x8xf32>
    %8 = tpu.matmul %7, %5, %cst_9 {dimension_numbers = #tpu.dot_dimension_numbers<[1], [1], [0], [0], [0, 0, 1, 0], [], []>} : vector<8x8xf32>, vector<8x8xf32>, vector<8x8xf32> -> vector<8x8xf32>
    %cst_10 = arith.constant dense<0xFF800000> : vector<8xf32>
    %9 = vector.multi_reduction <maximumf>, %8, %cst_10 [1] : vector<8x8xf32> to vector<8xf32>
    %10 = vector.shape_cast %9 : vector<8xf32> to vector<8x1xf32>
    %11 = vector.broadcast %10 : vector<8x1xf32> to vector<8x8xf32>
    %12 = arith.subf %8, %11 : vector<8x8xf32>
    %13 = math.exp2 %12 : vector<8x8xf32>
    %cst_11 = arith.constant dense<0.000000e+00> : vector<8xf32>
    %14 = vector.multi_reduction <add>, %13, %cst_11 [1] : vector<8x8xf32> to vector<8xf32>
    %15 = vector.shape_cast %14 : vector<8xf32> to vector<8x1xf32>
    %cst_12 = arith.constant dense<0.000000e+00> : vector<8x8xf32>
    %16 = tpu.matmul %13, %5, %cst_12 {dimension_numbers = #tpu.dot_dimension_numbers<[1], [0], [0], [1], [0, 0, 1, 1], [], []>} : vector<8x8xf32>, vector<8x8xf32>, vector<8x8xf32> -> vector<8x8xf32>
    %17 = tpu.reciprocal %15 {approx = true} : vector<8x1xf32> -> vector<8x1xf32>
    %18 = vector.broadcast %17 : vector<8x1xf32> to vector<8x8xf32>
    %19 = arith.mulf %16, %18 : vector<8x8xf32>
    %c0_13 = arith.constant 0 : index
    %c0_14 = arith.constant 0 : index
    %20 = vector.load %arg6[%c0_13, %c0_14] : memref<8x32xf32, #tpu.memory_space<vmem>>, vector<8x8xf32>
    tpu.vector_store %arg6[%c0_13, %c0_14], %19 {strides = array<i32>} : memref<8x32xf32, #tpu.memory_space<vmem>>, vector<8x8xf32>,
    %c0_15 = arith.constant 0 : index
    %c8 = arith.constant 8 : index
    %21 = vector.load %arg5[%c0_15, %c8] : memref<8x32xf32, #tpu.memory_space<vmem>>, vector<8x8xf32>
    %cst_16 = arith.constant 0.510069728 : f32
    %22 = vector.broadcast %cst_16 : f32 to vector<8x8xf32>
    %23 = arith.mulf %21, %22 : vector<8x8xf32>
    %cst_17 = arith.constant dense<0.000000e+00> : vector<8x8xf32>
    %24 = tpu.matmul %23, %21, %cst_17 {dimension_numbers = #tpu.dot_dimension_numbers<[1], [1], [0], [0], [0, 0, 1, 0], [], []>} : vector<8x8xf32>, vector<8x8xf32>, vector<8x8xf32> -> vector<8x8xf32>
    %cst_18 = arith.constant dense<0xFF800000> : vector<8xf32>
    %25 = vector.multi_reduction <maximumf>, %24, %cst_18 [1] : vector<8x8xf32> to vector<8xf32>
    %26 = vector.shape_cast %25 : vector<8xf32> to vector<8x1xf32>
    %27 = vector.broadcast %26 : vector<8x1xf32> to vector<8x8xf32>
    %28 = arith.subf %24, %27 : vector<8x8xf32>
    %29 = math.exp2 %28 : vector<8x8xf32>
    %cst_19 = arith.constant dense<0.000000e+00> : vector<8xf32>
    %30 = vector.multi_reduction <add>, %29, %cst_19 [1] : vector<8x8xf32> to vector<8xf32>
    %31 = vector.shape_cast %30 : vector<8xf32> to vector<8x1xf32>
    %cst_20 = arith.constant dense<0.000000e+00> : vector<8x8xf32>
    %32 = tpu.matmul %29, %21, %cst_20 {dimension_numbers = #tpu.dot_dimension_numbers<[1], [0], [0], [1], [0, 0, 1, 1], [], []>} : vector<8x8xf32>, vector<8x8xf32>, vector<8x8xf32> -> vector<8x8xf32>
    %33 = tpu.reciprocal %31 {approx = true} : vector<8x1xf32> -> vector<8x1xf32>
    %34 = vector.broadcast %33 : vector<8x1xf32> to vector<8x8xf32>
    %35 = arith.mulf %32, %34 : vector<8x8xf32>
    %c0_21 = arith.constant 0 : index
    %c8_22 = arith.constant 8 : index
    %36 = vector.load %arg6[%c0_21, %c8_22] : memref<8x32xf32, #tpu.memory_space<vmem>>, vector<8x8xf32>
    tpu.vector_store %arg6[%c0_21, %c8_22], %35 {strides = array<i32>} : memref<8x32xf32, #tpu.memory_space<vmem>>, vector<8x8xf32>,
    %c0_23 = arith.constant 0 : index
    %c16 = arith.constant 16 : index
    %37 = vector.load %arg5[%c0_23, %c16] : memref<8x32xf32, #tpu.memory_space<vmem>>, vector<8x8xf32>
    %cst_24 = arith.constant 0.510069728 : f32
    %38 = vector.broadcast %cst_24 : f32 to vector<8x8xf32>
    %39 = arith.mulf %37, %38 : vector<8x8xf32>
    %cst_25 = arith.constant dense<0.000000e+00> : vector<8x8xf32>
    %40 = tpu.matmul %39, %37, %cst_25 {dimension_numbers = #tpu.dot_dimension_numbers<[1], [1], [0], [0], [0, 0, 1, 0], [], []>} : vector<8x8xf32>, vector<8x8xf32>, vector<8x8xf32> -> vector<8x8xf32>
    %cst_26 = arith.constant dense<0xFF800000> : vector<8xf32>
    %41 = vector.multi_reduction <maximumf>, %40, %cst_26 [1] : vector<8x8xf32> to vector<8xf32>
    %42 = vector.shape_cast %41 : vector<8xf32> to vector<8x1xf32>
    %43 = vector.broadcast %42 : vector<8x1xf32> to vector<8x8xf32>
    %44 = arith.subf %40, %43 : vector<8x8xf32>
    %45 = math.exp2 %44 : vector<8x8xf32>
    %cst_27 = arith.constant dense<0.000000e+00> : vector<8xf32>
    %46 = vector.multi_reduction <add>, %45, %cst_27 [1] : vector<8x8xf32> to vector<8xf32>
    %47 = vector.shape_cast %46 : vector<8xf32> to vector<8x1xf32>
    %cst_28 = arith.constant dense<0.000000e+00> : vector<8x8xf32>
    %48 = tpu.matmul %45, %37, %cst_28 {dimension_numbers = #tpu.dot_dimension_numbers<[1], [0], [0], [1], [0, 0, 1, 1], [], []>} : vector<8x8xf32>, vector<8x8xf32>, vector<8x8xf32> -> vector<8x8xf32>
    %49 = tpu.reciprocal %47 {approx = true} : vector<8x1xf32> -> vector<8x1xf32>
    %50 = vector.broadcast %49 : vector<8x1xf32> to vector<8x8xf32>
    %51 = arith.mulf %48, %50 : vector<8x8xf32>
    %c0_29 = arith.constant 0 : index
    %c16_30 = arith.constant 16 : index
    %52 = vector.load %arg6[%c0_29, %c16_30] : memref<8x32xf32, #tpu.memory_space<vmem>>, vector<8x8xf32>
    tpu.vector_store %arg6[%c0_29, %c16_30], %51 {strides = array<i32>} : memref<8x32xf32, #tpu.memory_space<vmem>>, vector<8x8xf32>,
    %c0_31 = arith.constant 0 : index
    %c24 = arith.constant 24 : index
    %53 = vector.load %arg5[%c0_31, %c24] : memref<8x32xf32, #tpu.memory_space<vmem>>, vector<8x8xf32>
    %cst_32 = arith.constant 0.510069728 : f32
    %54 = vector.broadcast %cst_32 : f32 to vector<8x8xf32>
    %55 = arith.mulf %53, %54 : vector<8x8xf32>
    %cst_33 = arith.constant dense<0.000000e+00> : vector<8x8xf32>
    %56 = tpu.matmul %55, %53, %cst_33 {dimension_numbers = #tpu.dot_dimension_numbers<[1], [1], [0], [0], [0, 0, 1, 0], [], []>} : vector<8x8xf32>, vector<8x8xf32>, vector<8x8xf32> -> vector<8x8xf32>
    %cst_34 = arith.constant dense<0xFF800000> : vector<8xf32>
    %57 = vector.multi_reduction <maximumf>, %56, %cst_34 [1] : vector<8x8xf32> to vector<8xf32>
    %58 = vector.shape_cast %57 : vector<8xf32> to vector<8x1xf32>
    %59 = vector.broadcast %58 : vector<8x1xf32> to vector<8x8xf32>
    %60 = arith.subf %56, %59 : vector<8x8xf32>
    %61 = math.exp2 %60 : vector<8x8xf32>
    %cst_35 = arith.constant dense<0.000000e+00> : vector<8xf32>
    %62 = vector.multi_reduction <add>, %61, %cst_35 [1] : vector<8x8xf32> to vector<8xf32>
    %63 = vector.shape_cast %62 : vector<8xf32> to vector<8x1xf32>
    %cst_36 = arith.constant dense<0.000000e+00> : vector<8x8xf32>
    %64 = tpu.matmul %61, %53, %cst_36 {dimension_numbers = #tpu.dot_dimension_numbers<[1], [0], [0], [1], [0, 0, 1, 1], [], []>} : vector<8x8xf32>, vector<8x8xf32>, vector<8x8xf32> -> vector<8x8xf32>
    %65 = tpu.reciprocal %63 {approx = true} : vector<8x1xf32> -> vector<8x1xf32>
    %66 = vector.broadcast %65 : vector<8x1xf32> to vector<8x8xf32>
    %67 = arith.mulf %64, %66 : vector<8x8xf32>
    %c0_37 = arith.constant 0 : index
    %c24_38 = arith.constant 24 : index
    %68 = vector.load %arg6[%c0_37, %c24_38] : memref<8x32xf32, #tpu.memory_space<vmem>>, vector<8x8xf32>
    tpu.vector_store %arg6[%c0_37, %c24_38], %67 {strides = array<i32>} : memref<8x32xf32, #tpu.memory_space<vmem>>, vector<8x8xf32>,
    %c0_39 = arith.constant 0 : index
    %c0_40 = arith.constant 0 : index
    %69 = vector.load %arg6[%c0_39, %c0_40] : memref<8x32xf32, #tpu.memory_space<vmem>>, vector<8x32xf32>
    %c0_41 = arith.constant 0 : index
    %c0_42 = arith.constant 0 : index
    %70 = vector.load %arg3[%c0_41, %c0_42] : memref<32x32xf32, #tpu.memory_space<vmem>>, vector<32x32xf32>
    %cst_43 = arith.constant dense<0.000000e+00> : vector<8x32xf32>
    %71 = tpu.matmul %69, %70, %cst_43 {dimension_numbers = #tpu.dot_dimension_numbers<[1], [0], [0], [1], [0, 0, 1, 1], [], []>} : vector<8x32xf32>, vector<32x32xf32>, vector<8x32xf32> -> vector<8x32xf32>
    %c0_44 = arith.constant 0 : index
    %c0_45 = arith.constant 0 : index
    %c0_46 = arith.constant 0 : index
    %72 = vector.load %arg4[%c0_44, %c0_45, %c0_46] : memref<1x8x32xf32, #tpu.memory_space<vmem>>, vector<1x8x32xf32>
    %73 = vector.shape_cast %72 : vector<1x8x32xf32> to vector<8x32xf32>
    %74 = vector.shape_cast %71 : vector<8x32xf32> to vector<1x8x32xf32>
    tpu.vector_store %arg4[%c0_44, %c0_45, %c0_46], %74 {strides = array<i32>} : memref<1x8x32xf32, #tpu.memory_space<vmem>>, vector<1x8x32xf32>,
    return
  }
  func.func @transform_0(%arg0: i32) -> (i32, i32, i32) {
    %c0_i32 = arith.constant 0 : i32
    %c0_i32_0 = arith.constant 0 : i32
    %c0_i32_1 = arith.constant 0 : i32
    return %arg0, %c0_i32, %c0_i32_0 : i32, i32, i32
  }
  func.func @transform_1(%arg0: i32) -> (i32, i32) {
    %c0_i32 = arith.constant 0 : i32
    %c0_i32_0 = arith.constant 0 : i32
    %c0_i32_1 = arith.constant 0 : i32
    return %c0_i32, %c0_i32_0 : i32, i32
  }
  func.func @transform_2(%arg0: i32) -> (i32, i32) {
    %c0_i32 = arith.constant 0 : i32
    %c0_i32_0 = arith.constant 0 : i32
    %c0_i32_1 = arith.constant 0 : i32
    return %c0_i32, %c0_i32_0 : i32, i32
  }
  func.func @transform_3(%arg0: i32) -> (i32, i32, i32) {
    %c0_i32 = arith.constant 0 : i32
    %c0_i32_0 = arith.constant 0 : i32
    %c0_i32_1 = arith.constant 0 : i32
    return %arg0, %c0_i32, %c0_i32_0 : i32, i32, i32
  }
}

</mosaic_0001>

<bundles_post_ra>
// kernel: tpu_custom_call.1
= control target key start
LH: loop header
LB: loop body
LE: loop exit
PB: predicated region body
PF: predicated region fallthrough
CT: control target
= control target key end

     0   :  { %8 = vsyncpa [#allocation5], 0  ;;  %s1871_s0 = inlined_call_operand.hbm [shape: f32[2,8,32], index: 0, kind: input, shape index: {}]   ;;  %s1872_s1 = inlined_call_operand.hbm [shape: f32[32,32], index: 1, kind: input, shape index: {}]   ;;  %s1873_s2 = inlined_call_operand.hbm [shape: f32[32,32], index: 2, kind: input, shape index: {}]   ;;  %s1874_s3 = inlined_call_operand.hbm [shape: f32[2,8,32], index: 3, kind: output, shape index: {}]  }
   0x1   :  { %10 = vsyncpa [#allocation5 + $0x1], 0 }
   0x2   :  { %11 = vsyncpa [#allocation8], 0 }
   0x3   :  { %12 = vsyncpa [#allocation6], 0 }
   0x4   :  { %14 = vsyncpa [#allocation6 + $0x1], 0  ;;  %s1573_s12 = smov 0   ;;  %s1575_s13 = smov 0  }
   0x5   :  { %s1577_s14 = smov 0   ;;  %s1579_s15 = smov 0  }
   0x6 LB: > { %s1594_s16 = sadd.s32 4294967295, %s1536_s15   ;;  %s1156_s17 = sadd.s32 4294967294, %s1536_s15   ;;  %s1536_s15 = sphi %s1579_s15, %s1894_s15   ;;  %s1532_s14 = sphi %s1577_s14, %s1893_s14   ;;  %s1528_s13 = sphi %s1575_s13, %s1892_s13   ;;  %s1524_s12 = sphi %s1573_s12, %s1891_s12  }
   0x7   : > { %p40_p0 = scmp.ne.s32.totalorder %s1528_s13, %s1524_s12  ;;  %p1875_p1 = scmp.eq.s32.totalorder %s1594_s16, 0 }
   0x8   : > { %p112_p3 = scmp.eq.s32.totalorder %s1156_s17, 1  ;;  %p1157_p5 = scmp.ge.s32.totalorder %s1536_s15, 1 }
   0x9   : > { %p1603_p4 = por %p1875_p1, %p40_p0  ;;  %p119_p7 = scmp.lt.s32.totalorder %s1536_s15, 3 }
   0xa   : > { %p1608_p6 = por %p112_p3, %p40_p0  ;;  %s1538_s21 = smov [#allocation7]  }
   0xb   : > { %s1878_s18 = scalar_select %p1603_p4, 1, 0 }
   0xc   : > { %s1879_s19 = scalar_select %p1608_p6, 1, 0 }
   0xd   : > { %p1613_p8 = pnand %p1157_p5, %p119_p7  ;;  %s131_s22 = sshll.u32 %s1538_s21, 4  ;;  %s1617_s22 = int_to_ptr.vmem [resolvable:$true] %s131_s22 }
   0xe   : > { %s1539_s24 = smov [#allocation9]   ;;  %s1380_s28 = scalar_lea.hbm %s1872_s1, 512 }
   0xf   : > { %p1298_p9 = pneg %p1613_p8  ;;  %s144_s25 = sshll.u32 %s1539_s24, 4  ;;  %s1628_s25 = int_to_ptr.vmem [resolvable:$true] %s144_s25 }
  0x10   : > { %p1381_p12 = scmp.ne.s32.totalorder %s1872_s1, %s1380_s28  ;;  %p1387_p5 = scmp.lt.u32.totalorder %s1380_s28, %s1872_s1 }
  0x11   : > { %p1624_p11 = pnand %p1298_p9, %p1875_p1 }
  0x13   : > { %p1382_p13 = pneg %p1624_p11 }
  0x15   : > { %p1383_p0 = pnand %p1382_p13, %p1381_p12 }
  0x17   : > { %p1384_p3 = pneg %p1383_p0 }
  0x19   : > { %p1389_p7 = pnand %p1387_p5, %p1384_p3 }
  0x1b   : > { %1392 = shalt.err (!%p1389_p7)
}
  0x1c   : > { %s1393_s6 = scalar_lea.vmem %s1617_s22, 512  ;;  %p1401_p2 = scmp.lt.s32.totalorder %s1617_s22, %s1617_s22 }
  0x1d   : > { %p1394_p9 = scmp.ne.s32.totalorder %s1617_s22, %s1393_s6  ;;  %p1402_p12 = scmp.lt.s32.totalorder %s1393_s6, %s1393_s6 }
  0x1f   : > { %p1396_p10 = pnand %p1394_p9, %p1382_p13  ;;  %p1403_p0 = por %p1402_p12, %p1401_p2 }
  0x21   : > { %p1397_p1 = pneg %p1396_p10 }
  0x23   : > { %p1404_p6 = pnand %p1403_p0, %p1397_p1 }
  0x25   : > { %1407 = shalt.err (!%p1404_p6)
}
  0x26   : > { %s1540_s7 = smov 128   ;;  %s1541_s8 = smov 8  }
  0x27   : > { %1301 = dma.hbm_to_vmem [thread:$0]  (!%p1624_p11), %s1872_s1, 512, %s1617_s22, [#allocation8], %s1540_s7, %s1540_s7, %s1541_s8  }
  0x28   : > { %s1408_s21 = scalar_lea.hbm %s1873_s2, 512 }
  0x29   : > { %p1409_p2 = scmp.ne.s32.totalorder %s1873_s2, %s1408_s21  ;;  %p1415_p10 = scmp.lt.u32.totalorder %s1408_s21, %s1873_s2 }
  0x2b   : > { %p1411_p1 = pnand %p1409_p2, %p1382_p13 }
  0x2d   : > { %p1412_p6 = pneg %p1411_p1 }
  0x2f   : > { %p1417_p3 = pnand %p1415_p10, %p1412_p6 }
  0x31   : > { %1420 = shalt.err (!%p1417_p3)
}
  0x32   : > { %s1421_s22 = scalar_lea.vmem %s1628_s25, 512  ;;  %p1429_p12 = scmp.lt.s32.totalorder %s1628_s25, %s1628_s25 }
  0x33   : > { %p1422_p5 = scmp.ne.s32.totalorder %s1628_s25, %s1421_s22  ;;  %p1430_p0 = scmp.lt.s32.totalorder %s1421_s22, %s1421_s22 }
  0x35   : > { %p1424_p7 = pnand %p1422_p5, %p1382_p13  ;;  %p1431_p2 = por %p1430_p0, %p1429_p12 }
  0x37   : > { %p1425_p9 = pneg %p1424_p7 }
  0x39   : > { %p1432_p1 = pnand %p1431_p2, %p1425_p9 }
  0x3b   : > { %1435 = shalt.err (!%p1432_p1)
}
  0x3c   : > { %1304 = dma.hbm_to_vmem [thread:$0]  (!%p1624_p11), %s1873_s2, 512, %s1628_s25, [#allocation8], %s1540_s7, %s1540_s7, %s1541_s8  }
  0x3d   : > { %s1683_s4 = sadd.s32 1, %s1536_s15   ;;  %s27_s23 = sadd.s32 1, %s1532_s14 }
  0x3e   : > { %s24_s5 = ssub.s32 %s1536_s15, %s1683_s4  ;;  %p34_p13 = scmp.ne.s32.totalorder %s1532_s14, %s1528_s13 }
  0x3f   : > { %p25_p6 = scmp.eq.s32.totalorder %s24_s5, 0  ;;  %p35_p10 = scmp.eq.s32.totalorder %s1536_s15, 0 }
  0x40   : > { %p1882_p3 = scmp.eq.s32.totalorder %s1594_s16, 1  ;;  %p1315_p7 = scmp.lt.s32.totalorder %s1536_s15, 2 }
  0x41   : > { %s1699_s9 = scalar_select %p25_p6, %s1532_s14, %s27_s23  }
  0x42   : > { %p1693_p5 = por %p1882_p3, %p34_p13  ;;  %p36_p9 = por %p35_p10, %p34_p13 }
  0x43   : > { %s158_s10 = sand.u32 1, %s1532_s14   ;;  %s1162_s25 = sshll.u32 %s1536_s15, 7 }
  0x44   : > { %s1883_s6 = scalar_select %p1693_p5, 1, 0 }
  0x45   : > { %s1161_s11 = sshll.u32 %s158_s10, 3  ;;  %s1706_s17 = scalar_lea.hbm %s1871_s0, %s1162_s25 }
  0x46   : > { %s162_s21 = scalar_lea.vmem [#allocation4], %s1161_s11  ;;  %p1710_p11 = pnand %p1315_p7, %p36_p9 }
  0x47   : > { %s169_s24 = sshll.u32 %s162_s21, 4  ;;  %s159_s27 = scalar_lea.sflag [#allocation5], %s158_s10  ;;  %s1708_s24 = int_to_ptr.vmem [resolvable:$true] %s169_s24 }
  0x48   : > { %s1436_s28 = scalar_lea.hbm %s1706_s17, 128  ;;  %p1438_p0 = pneg %p1710_p11 }
  0x49   : > { %p1437_p12 = scmp.ne.s32.totalorder %s1706_s17, %s1436_s28  ;;  %s1441_s30 = scalar_lea.hbm %s1871_s0, 256 }
  0x4a   : > { %p1442_p13 = scmp.lt.u32.totalorder %s1706_s17, %s1871_s0  ;;  %p1443_p6 = scmp.lt.u32.totalorder %s1441_s30, %s1436_s28 }
  0x4b   : > { %p1439_p2 = pnand %p1438_p0, %p1437_p12  ;;  %p1445_p3 = scmp.lt.u32.totalorder %s1436_s28, %s1706_s17 }
  0x4c   : > { %p1444_p10 = por %p1443_p6, %p1442_p13 }
  0x4d   : > { %p1440_p1 = pneg %p1439_p2 }
  0x4e   : > { %p1446_p7 = por %p1445_p3, %p1444_p10 }
  0x50   : > { %p1447_p9 = pnand %p1446_p7, %p1440_p1 }
  0x52   : > { %1450 = shalt.err (!%p1447_p9)
}
  0x53   : > { %s1451_s10 = scalar_lea.vmem %s1708_s24, 128  ;;  %s1542_s11 = smov [#allocation4]  }
  0x54   : > { %p1452_p12 = scmp.ne.s32.totalorder %s1708_s24, %s1451_s10  ;;  %s1456_s25 = sshll.u32 %s1542_s11, 4  ;;  %s1457_s25 = int_to_ptr.vmem [resolvable:$false] %s1456_s25 }
  0x55   : > { %s1458_s7 = scalar_lea.vmem %s1457_s25, 256  ;;  %p1459_p4 = scmp.lt.s32.totalorder %s1708_s24, %s1457_s25 }
  0x56   : > { %p1454_p2 = pnand %p1452_p12, %p1438_p0  ;;  %p1460_p13 = scmp.lt.s32.totalorder %s1458_s7, %s1451_s10 }
  0x58   : > { %p1455_p5 = pneg %p1454_p2  ;;  %p1461_p6 = por %p1460_p13, %p1459_p4 }
  0x5a   : > { %p1462_p10 = pnand %p1461_p6, %p1455_p5 }
  0x5c   : > { %1465 = shalt.err (!%p1462_p10)
}
  0x5d   : > { %1308 = dma.hbm_to_vmem [thread:$0]  (!%p1710_p11), %s1706_s17, 128, %s1708_s24, %s159_s27  }
  0x5e   : > { %178 = sbr.rel (%p1613_p8) target bundleno = 1649 (0x671), region = 32  ;;  %s1742_s8 = sand.u32 (!%p1613_p8), 1, %s1528_s13  }
  0x5f   : > { %s1164_s21 = sshll.u32 (!%p1613_p8), %s1742_s8, 3  ;;  %s181_s28 = scalar_lea.sflag (!%p1613_p8), [#allocation5], %s1742_s8 }
  0x60   : > { %s184_s22 = scalar_lea.vmem (!%p1613_p8), [#allocation4], %s1164_s21  ;;  %p1885_p4 = scmp.ne.s32.totalorder (!%p1613_p8), %s1878_s18, 0 }
  0x65   : > { %1511 = dma.done.wait (%p1885_p4), %s181_s28, 128  }
  0x66   : > { %1513 = vsyncadd (%p1885_p4), %s181_s28, 4294967168  ;;  %p1886_p5 = scmp.eq.s32.totalorder %s1594_s16, 0 }
  0x68   : > { %1515 = dma.done.wait (%p1886_p5), [#allocation8], 1024   ;;  %p1887_p8 = pmov %p1886_p5 }
  0x69   : > { %v1543_v0 = vmov 0.0|0.0   ;;  %vm1544_vm0 = vmmov 0   ;;  %v1545_v1 = vmov 0.0   ;;  %v216_v2 = vld [vmem:[#allocation7] sm:$0xff]  ;;  %v217_v3 = vld [vmem:[#allocation7 + $0x8] sm:$0xff]  ;;  %v218_v4 = vld [vmem:[#allocation7 + $0x10] sm:$0xff] }
  0x6a   : > { %1517 = vsyncadd (%p1887_p8), [#allocation8], 4294966272  ;;  %1274 = vmatprep.subr.bf16.mxu0 %v1543_v0  ;;  %1220 = vmatprep.mubr.msk.f32.mxu0 %vm1544_vm0, %v1545_v1  ;;  %v1275_v5 = vpack.c.bf16 %v217_v3, %v216_v2  ;;  %v219_v6 = vld [vmem:[#allocation7 + $0x18] sm:$0xff]  ;;  %vm220_vm1 = vcmask 261120   ;;  %vm297_vm2 = vcmask 64512   ;;  %s1546_s18 = smov 120  }
  0x6b   : > { %1223 = vmatprep.subr.mxu1 %v1545_v1  ;;  %1225 = vmatprep.mubr.msk.f32.mxu1 %vm1544_vm0, %v1545_v1  ;;  %v1278_v7 = vpack.c.bf16 %v219_v6, %v218_v4  ;;  %v215_v8 = vld [vmem:[%s184_s22] sm:$0xff]  ;;  %s1547_s20 = smov 112   ;;  %s1548_s17 = smov 104   ;;  %v975_v55 = vld [vmem:[#allocation9] sm:$0xff]  ;;  %v976_v56 = vld [vmem:[#allocation9 + $0x8] sm:$0xff]  ;;  %vm628_vm3 = vcmask 130112  }
  0x6c   : > { %1276 = vmatpush3.bf16.msra.mxu0 %v1275_v5  ;;  %v1281_v57 = vpack.c.bf16 %v976_v56, %v975_v55  ;;  %v977_v58 = vld [vmem:[#allocation9 + $0x10] sm:$0xff]  ;;  %v978_v59 = vld [vmem:[#allocation9 + $0x18] sm:$0xff]  ;;  %s1549_s24 = smov 8   ;;  %s1550_s26 = smov 16   ;;  %vm800_vm4 = vcmask 195712   ;;  %vm972_vm5 = vcmask 261312  }
  0x6d   : > { %1277 = vmatprep.subr.bf16.mxu0 %v1543_v0  ;;  %v1284_v62 = vpack.c.bf16 %v978_v59, %v977_v58  ;;  %s1551_s27 = smov 24   ;;  %s1183_s29 = sshll.u32 %s1594_s16, 7 }
  0x6e   : > { %s214_s30 = scalar_lea.vmem [#allocation10], %s1164_s21  ;;  %s1826_s11 = scalar_lea.hbm %s1874_s3, %s1183_s29 }
  0x6f   : > { %s1067_s23 = sshll.u32 %s214_s30, 4  ;;  %s1054_s25 = scalar_lea.sflag [#allocation6], %s1742_s8  ;;  %s1828_s23 = int_to_ptr.vmem [resolvable:$true] %s1067_s23 }
  0x70   : > { %1279 = vmatpush3.bf16.msra.mxu0 %v1278_v7  ;;  %s1466_s7 = scalar_lea.vmem %s1828_s23, 128  ;;  %p1888_p0 = scmp.ne.s32.totalorder %s1883_s6, 0 }
  0x71   : > { %1243 = vmatprep.subr.mxu0 %v1545_v1  ;;  %p1467_p11 = scmp.ne.s32.totalorder %s1828_s23, %s1466_s7  ;;  %s1552_s16 = smov [#allocation10]  }
  0x72   : > { %s1470_s21 = sshll.u32 %s1552_s16, 4  ;;  %s1471_s21 = int_to_ptr.vmem [resolvable:$false] %s1470_s21 }
  0x73   : > { %1221 = vmatmul.mubr.msk.f32.vlgmr.msra.gmra.mrb[0].mxu0 %vm220_vm1, %v215_v8  ;;  %p1468_p1 = pnand %p1467_p11, %p1888_p0  ;;  %s1472_s28 = scalar_lea.vmem %s1471_s21, 256 }
  0x74   : > { %1245 = vmatprep.mubr.msk.f32.mxu0 %vm1544_vm0, %v1545_v1  ;;  %p1473_p7 = scmp.lt.s32.totalorder %s1828_s23, %s1471_s21  ;;  %p1474_p9 = scmp.lt.s32.totalorder %s1472_s28, %s1466_s7 }
  0x75   : > { %p1469_p3 = pneg %p1468_p1 }
  0x76   : > { %p1475_p12 = por %p1474_p9, %p1473_p7 }
  0x78   : > { %p1476_p2 = pnand %p1475_p12, %p1469_p3 }
 0x146   : > { %v290_v9 = vpop.f32.mrb[0].mxu0 }
 0x147   : > { %294 = vst.msk [vmem:[#allocation2] sm:$0xff] %vm220_vm1, %v290_v9  ;;  %v1222_v10 = vpop.f32.mrb[1].mxu0 }
 0x14e   : > { %v295_v11 = vld [vmem:[#allocation2] sm:$0xff] }
 0x14f   : > { %v296_v12 = vmul.f32 0.5100697, %v295_v11  ;;  %1224 = vmatpush3.xpose.msk.msra.mxu1 %vm297_vm2, %v295_v11 }
 0x150   : > { %1228 = vmatprep.subr.mxu1 %v1545_v1 }
 0x151   : > { %461 = vrot.lane.b32.xlu1 %v296_v12, %s1546_s18 }
 0x152   : > { %1226 = vmatmul.mubr.msk.f32.vlgmr.msra.gmra.mrb[0].mxu1 %vm297_vm2, %v296_v12 }
 0x153   : > { %1229 = vmatpush3.msra.mxu1 %v295_v11  ;;  %1230 = vmatprep.mubr.msk.f32.mxu1 %vm1544_vm0, %v1545_v1 }
 0x154   : > { %1233 = vmatprep.subr.mxu1 %v1545_v1 }
 0x155   : > { %636 = vrot.lane.b32.xlu1 %v295_v11, %s1547_s20 }
 0x159   : > { %633 = vrot.lane.b32.xlu1 %v296_v12, %s1547_s20 }
 0x15d   : > { %808 = vrot.lane.b32.xlu1 %v295_v11, %s1548_s17 }
 0x161   : > { %805 = vrot.lane.b32.xlu1 %v296_v12, %s1548_s17 }
 0x1c3   : > { %v462_v13 = vpop.permute.xlu1 %461 }
 0x1c7   : > { %v1774_v14 = vpop.permute.xlu1 %636 }
 0x1c8   : > { %1244 = vmatpush3.xpose.msk.msra.mxu0 %vm297_vm2, %v1774_v14 }
 0x1c9   : > { %1253 = vmatprep.subr.mxu0 %v1545_v1 }
 0x1cb   : > { %v634_v15 = vpop.permute.xlu1 %633 }
 0x1cc   : > { %1246 = vmatmul.mubr.msk.f32.vlgmr.msra.gmra.mrb[2].mxu0 %vm297_vm2, %v634_v15 }
 0x1cd   : > { %1255 = vmatprep.mubr.msk.f32.mxu0 %vm1544_vm0, %v1545_v1 }
 0x1cf   : > { %v1782_v16 = vpop.permute.xlu1 %808 }
 0x1d0   : > { %1254 = vmatpush3.xpose.msk.msra.mxu0 %vm297_vm2, %v1782_v16 }
 0x1d1   : > { %1280 = vmatprep.subr.bf16.mxu0 %v1543_v0 }
 0x1d3   : > { %v806_v17 = vpop.permute.xlu1 %805 }
 0x1d4   : > { %1256 = vmatmul.mubr.msk.f32.vlgmr.msra.gmra.mrb[4].mxu0 %vm297_vm2, %v806_v17 }
 0x1d5   : > { %1271 = vmatprep.mubr.msk.f32.mxu0 %vm1544_vm0, %v1545_v1  ;;  %1282 = vmatpush3.bf16.msra.mxu0 %v1281_v57 }
 0x1d6   : > { %1283 = vmatprep.subr.bf16.mxu0 %v1543_v0 }
 0x1d9   : > { %1285 = vmatpush3.bf16.msra.mxu0 %v1284_v62 }
 0x225   : > { %v370_v18 = vpop.f32.mrb[0].mxu1 }
 0x226   : > { %v1227_v19 = vpop.f32.mrb[1].mxu1  ;;  %v374_v20 = vsel %vm297_vm2, %v370_v18, -inf }
 0x227   : > { %375 = vmax.xlane.f32.xlu0 %v374_v20 }
 0x23d   : > { %464 = vrot.lane.b32.xlu0 %v295_v11, %s1546_s18 }
 0x29f   : > { %v708_v21 = vpop.f32.mrb[2].mxu0 }
 0x2a0   : > { %v1247_v22 = vpop.f32.mrb[3].mxu0  ;;  %v712_v23 = vsel %vm297_vm2, %v708_v21, -inf }
 0x2a1   : > { %713 = vmax.xlane.f32.xlu0 %v712_v23 }
 0x2a7   : > { %v880_v24 = vpop.f32.mrb[4].mxu0 }
 0x2a8   : > { %v1257_v25 = vpop.f32.mrb[5].mxu0  ;;  %v884_v37 = vsel %vm297_vm2, %v880_v24, -inf }
 0x2b4   : > { %v376_v26 = vpop.xlane.xlu0 %375 }
 0x2b5   : > { %v377_v27 = vsub.f32 %v370_v18, %v376_v26 }
 0x2b7   : > { %1364 = vpow2.f32 %v377_v27 }
 0x2b8   : > { %v465_v29 = vpop.permute.xlu0 %464 }
 0x2c1   : > { %v1365_v28 = vpop.eup %1364 }
 0x2c2   : > { %1231 = vmatmul.mubr.msk.f32.vlgmr.msra.gmra.mrb[2].mxu1 %vm297_vm2, %v1365_v28  ;;  %v379_v40 = vsel %vm297_vm2, %v1365_v28, 0.0 }
 0x2c3   : > { %1234 = vmatpush3.xpose.msk.msra.mxu1 %vm297_vm2, %v465_v29  ;;  %1235 = vmatprep.mubr.msk.f32.mxu1 %vm1544_vm0, %v1545_v1 }
 0x2c4   : > { %1238 = vmatprep.subr.mxu1 %v1545_v1 }
 0x2c6   : > { %1236 = vmatmul.mubr.msk.f32.vlgmr.msra.gmra.mrb[4].mxu1 %vm297_vm2, %v462_v13 }
 0x2c7   : > { %1239 = vmatpush3.msra.mxu1 %v465_v29  ;;  %1240 = vmatprep.mubr.msk.f32.mxu1 %vm1544_vm0, %v1545_v1 }
 0x2c8   : > { %1248 = vmatprep.subr.mxu1 %v1545_v1 }
 0x32e   : > { %v714_v30 = vpop.xlane.xlu0 %713 }
 0x32f   : > { %v715_v31 = vsub.f32 %v708_v21, %v714_v30 }
 0x331   : > { %1366 = vpow2.f32 %v715_v31 }
 0x33b   : > { %v1367_v38 = vpop.eup %1366 }
 0x33c   : > { %v717_v39 = vsel %vm297_vm2, %v1367_v38, 0.0 }
 0x395   : > { %v451_v32 = vpop.f32.mrb[2].mxu1 }
 0x396   : > { %v1232_v33 = vpop.f32.mrb[3].mxu1 }
 0x399   : > { %v536_v34 = vpop.f32.mrb[4].mxu1 }
 0x39a   : > { %v1237_v35 = vpop.f32.mrb[5].mxu1  ;;  %v540_v36 = vsel %vm297_vm2, %v536_v34, -inf }
 0x39b   : > { %541 = vmax.xlane.f32.xlu1 %v540_v36 }
 0x39f   : > { %885 = vmax.xlane.f32.xlu1 %v884_v37 }
 0x3a3   : > { %718 = vadd.xlane.f32.xlu1 %v717_v39 }
 0x3a7   : > { %380 = vadd.xlane.f32.xlu1 %v379_v40 }
 0x428   : > { %v542_v41 = vpop.xlane.xlu1 %541 }
 0x429   : > { %v543_v42 = vsub.f32 %v536_v34, %v542_v41 }
 0x42b   : > { %1368 = vpow2.f32 %v543_v42 }
 0x42c   : > { %v886_v43 = vpop.xlane.xlu1 %885 }
 0x42d   : > { %v887_v44 = vsub.f32 %v880_v24, %v886_v43 }
 0x42f   : > { %1370 = vpow2.f32 %v887_v44 }
 0x430   : > { %v719_v45 = vpop.xlane.xlu1 %718 }
 0x434   : > { %v381_v46 = vpop.xlane.xlu1 %380 }
 0x435   : > { %v1369_v47 = vpop.eup %1368  ;;  %1372 = vrcp.f32 %v381_v46 }
 0x436   : > { %1241 = vmatmul.mubr.msk.f32.vlgmr.msra.gmra.mrb[6].mxu1 %vm297_vm2, %v1369_v47  ;;  %v545_v48 = vsel %vm297_vm2, %v1369_v47, 0.0 }
 0x437   : > { %1249 = vmatpush3.msra.mxu1 %v1774_v14  ;;  %546 = vadd.xlane.f32.xlu0 %v545_v48 }
 0x438   : > { %1250 = vmatprep.mubr.msk.f32.mxu1 %vm1544_vm0, %v1545_v1  ;;  %1258 = vmatprep.subr.mxu1 %v1545_v1 }
 0x439   : > { %v1371_v49 = vpop.eup %1370 }
 0x43a   : > { %1251 = vmatmul.mubr.msk.f32.vlgmr.msra.gmra.mrb[8].mxu1 %vm297_vm2, %v1367_v38  ;;  %v889_v50 = vsel %vm297_vm2, %v1371_v49, 0.0 }
 0x43b   : > { %1259 = vmatpush3.msra.mxu1 %v1782_v16  ;;  %890 = vadd.xlane.f32.xlu0 %v889_v50 }
 0x43c   : > { %1260 = vmatprep.mubr.msk.f32.mxu1 %vm1544_vm0, %v1545_v1 }
 0x43e   : > { %1261 = vmatmul.mubr.msk.f32.vlgmr.msra.gmra.mrb[10].mxu1 %vm297_vm2, %v1371_v49 }
 0x43f   : > { %v1373_v51 = vpop.eup %1372 }
 0x440   : > { %v456_v52 = vmul.f32 %v1373_v51, %v451_v32 }
 0x442   : > { %457 = vst.msk [vmem:[#allocation3] sm:$0xff] %vm297_vm2, %v456_v52 }
 0x4c4   : > { %v547_v53 = vpop.xlane.xlu0 %546 }
 0x4c5   : > { %1374 = vrcp.f32 %v547_v53 }
 0x4c6   : > { %1376 = vrcp.f32 %v719_v45 }
 0x4c8   : > { %v891_v54 = vpop.xlane.xlu0 %890 }
 0x4c9   : > { %1378 = vrcp.f32 %v891_v54 }
 0x4cf   : > { %v1375_v60 = vpop.eup %1374 }
 0x4d0   : > { %v1377_v2 = vpop.eup %1376 }
 0x4d3   : > { %v1379_v6 = vpop.eup %1378 }
 0x509   : > { %v618_v61 = vpop.f32.mrb[6].mxu1 }
 0x50a   : > { %v623_v63 = vmul.f32 %v1375_v60, %v618_v61  ;;  %v1242_v1 = vpop.f32.mrb[7].mxu1 }
 0x50c   : > { %625 = vrot.lane.b32.xlu0 %v623_v63, %s1549_s24 }
 0x50d   : > { %v790_v3 = vpop.f32.mrb[8].mxu1 }
 0x50e   : > { %v795_v4 = vmul.f32 %v1377_v2, %v790_v3  ;;  %v1252_v5 = vpop.f32.mrb[9].mxu1 }
 0x510   : > { %797 = vrot.lane.b32.xlu1 %v795_v4, %s1550_s26 }
 0x511   : > { %v962_v7 = vpop.f32.mrb[10].mxu1 }
 0x512   : > { %v967_v8 = vmul.f32 %v1379_v6, %v962_v7  ;;  %v1262_v9 = vpop.f32.mrb[11].mxu1 }
 0x514   : > { %969 = vrot.lane.b32.xlu1 %v967_v8, %s1551_s27 }
 0x57e   : > { %v626_v10 = vpop.permute.xlu0 %625 }
 0x57f   : > { %629 = vst.msk [vmem:[#allocation3] sm:$0xff] %vm628_vm3, %v626_v10 }
 0x582   : > { %v798_v0 = vpop.permute.xlu1 %797 }
 0x583   : > { %801 = vst.msk [vmem:[#allocation3] sm:$0xff] %vm800_vm4, %v798_v0 }
 0x586   : > { %v970_v11 = vpop.permute.xlu1 %969 }
 0x587   : > { %973 = vst.msk [vmem:[#allocation3] sm:$0xff] %vm972_vm5, %v970_v11 }
 0x58e   : > { %v974_v12 = vld [vmem:[#allocation3] sm:$0xff] }
 0x58f   : > { %1272 = vmatmul.mubr.msk.f32.vlgmr.msra.gmra.mrb[6].mxu0 %vm220_vm1, %v974_v12 }
 0x662   : > { %v1048_v13 = vpop.f32.mrb[6].mxu0 }
 0x663   : > { %1052 = vst.msk [vmem:[%s214_s30] sm:$0xff] %vm220_vm1, %v1048_v13  ;;  %v1273_v14 = vpop.f32.mrb[7].mxu0 }
 0x664   : > { %1479 = shalt.err (!%p1476_p2)
}
 0x665   : > { %s1480_s8 = scalar_lea.hbm %s1826_s11, 128  ;;  %s1484_s20 = scalar_lea.hbm %s1874_s3, 256 }
 0x666   : > { %p1481_p13 = scmp.ne.s32.totalorder %s1826_s11, %s1480_s8  ;;  %p1485_p4 = scmp.lt.u32.totalorder %s1826_s11, %s1874_s3 }
 0x667   : > { %p1486_p5 = scmp.lt.u32.totalorder %s1484_s20, %s1480_s8  ;;  %p1488_p11 = scmp.lt.u32.totalorder %s1480_s8, %s1826_s11 }
 0x668   : > { %p1482_p6 = pnand %p1481_p13, %p1888_p0 }
 0x669   : > { %p1487_p8 = por %p1486_p5, %p1485_p4 }
 0x66a   : > { %p1483_p10 = pneg %p1482_p6 }
 0x66b   : > { %p1489_p1 = por %p1488_p11, %p1487_p8 }
 0x66d   : > { %p1490_p3 = pnand %p1489_p1, %p1483_p10 }
 0x66f   : > { %1493 = shalt.err (!%p1490_p3)
}
 0x670   : > { %1296 = dma.vmem_to_hbm [thread:$0]  (%p1888_p0), %s1828_s23, 128, %s1826_s11, %s1054_s25  }
 0x671 PF: > { %s1079_s26 = sand.u32 1, %s1524_s12   ;;  %p1889_p7 = scmp.ne.s32.totalorder %s1879_s19, 0 }
 0x672   : > { %p1890_p9 = scmp.ge.s32.totalorder %s1536_s15, 2  ;;  %s1080_s27 = scalar_lea.sflag [#allocation6], %s1079_s26 }
 0x674   : > { %p1310_p12 = pnand %p1890_p9, %p1889_p7 }
 0x676   : > { %1519 = dma.done.wait (!%p1310_p12), %s1080_s27, 128  }
 0x677   : > { %1521 = vsyncadd (!%p1310_p12), %s1080_s27, 4294967168  ;;  %p17_p2 = scmp.ge.s32.totalorder %s1683_s4, 4   ;;  %s1891_s12 = smov %s1528_s13 }
 0x678   : > { %s1892_s13 = smov %s1532_s14  ;;  %s1893_s14 = smov %s1699_s9 }
 0x679   : > { %s1894_s15 = smov %s1683_s4  ;;  %19 = sbr.rel (!%p17_p2) target bundleno = 6 (0x6), region = 85 }
 0x680   :  { %1085 = vsyncpa [#allocation5], 1 }
 0x681   :  { %1087 = vsyncpa [#allocation5 + $0x1], 1 }
 0x682   :  { %1088 = vsyncpa [#allocation8], 1 }
 0x683   :  { %1089 = vsyncpa [#allocation6], 1 }
 0x684   :  { %1091 = vsyncpa [#allocation6 + $0x1], 1 }

</bundles_post_ra>
